<compile_context>
chip_gen: v7x
topology: tpu7x:2x2x1
jax: 0.10.0
libtpu: 0.0.40
codegen_flags: <defaults>
</compile_context>

<pallas_src>
import functools

import jax
import jax.numpy as jnp
from jax.experimental import pallas as pl
from jax.experimental.pallas import tpu as pltpu

_LANE = 128
_SUBLANE_BF16 = 16


def _round_up(x, m):
    return (x + m - 1) // m * m


@functools.lru_cache(maxsize=1)
def _vmem_capacity_bytes():
    # Narrow hardware query only (not a compile fallback): 128 MiB on
    # v5e/v6e, 64 MiB per TensorCore on v7x.  Conservative default if the
    # query is unavailable on this build.
    try:
        return int(pltpu.get_tpu_info().vmem_capacity_bytes)
    except Exception:
        return 64 << 20


def _swiglu_kernel(x_ref, w_ig_ref, b_ig_ref, w_h1_ref, b_h1_ref,
                   w_h2_ref, b_h2_ref, o_ref, a_sc, g_sc, acc_sc):
    j = pl.program_id(1)
    D = o_ref.shape[-1]

    @pl.when(j == 0)
    def _():
        # Fused linear_in / linear_out: one (bm, 2D) MXU matmul, f32 accum.
        x = x_ref[...].astype(jnp.bfloat16)
        ag = jnp.dot(x, w_ig_ref[...], preferred_element_type=jnp.float32)
        ag = ag + b_ig_ref[...]
        a_sc[...] = ag[:, :D].astype(jnp.bfloat16)   # linear_in(x), MXU-ready
        g_sc[...] = ag[:, D:]                        # gate, short vreg live range
        acc_sc[...] = jnp.zeros_like(acc_sc)

    # Stream one hidden tile: h = a @ w_h1[:, tile] + b_h1[tile]
    h = jnp.dot(a_sc[...], w_h1_ref[...],
                preferred_element_type=jnp.float32) + b_h1_ref[...]
    swish = h * jax.nn.sigmoid(h)                    # f32 VPU/EUP
    acc_sc[...] += jnp.dot(swish.astype(jnp.bfloat16), w_h2_ref[...],
                           preferred_element_type=jnp.float32)

    @pl.when(j == pl.num_programs(1) - 1)
    def _():
        s = acc_sc[...] + b_h2_ref[...]
        o_ref[...] = (s * g_sc[...]).astype(o_ref.dtype)


@functools.partial(
    jax.jit,
    static_argnames=("block_m", "block_h", "vmem_limit", "out_dtype"))
def _swiglu_call(x2, w_ig, b_ig, w_h1, b_h1, w_h2, b_h2, *,
                 block_m, block_h, vmem_limit, out_dtype):
    M, D = x2.shape
    H = w_h1.shape[-1]
    assert H % block_h == 0

    rows = lambda i, j: (i, 0)     # x / out: tiled over rows, resident over j
    const = lambda i, j: (0, 0)    # fused in/out weights & biases
    h_col = lambda i, j: (0, j)    # w_h1 / b_h1 hidden-column tiles
    h_row = lambda i, j: (j, 0)    # w_h2 hidden-row tiles

    in_specs = [
        pl.BlockSpec((block_m, D), rows),     # x (original dtype)
        pl.BlockSpec((D, 2 * D), const),      # w_in ++ w_out (bf16)
        pl.BlockSpec((1, 2 * D), const),      # b_in ++ b_out (f32)
        pl.BlockSpec((D, block_h), h_col),    # w_h1 tile (bf16)
        pl.BlockSpec((1, block_h), h_col),    # b_h1 tile (f32)
        pl.BlockSpec((block_h, D), h_row),    # w_h2 tile (bf16)
        pl.BlockSpec((1, D), const),          # b_h2 (f32)
    ]
    out_specs = pl.BlockSpec((block_m, D), rows)

    out_itemsize = jnp.dtype(out_dtype).itemsize
    cost = pl.CostEstimate(
        flops=2 * M * (2 * D * D + 2 * D * H),
        transcendentals=M * H,                              # sigmoid
        bytes_accessed=int(x2.size * x2.dtype.itemsize
                           + M * D * out_itemsize
                           + (w_ig.size + w_h1.size + w_h2.size) * 2
                           + (b_ig.size + b_h1.size + b_h2.size) * 4),
    )

    return pl.pallas_call(
        _swiglu_kernel,
        out_shape=jax.ShapeDtypeStruct((M, D), out_dtype),
        grid_spec=pltpu.PrefetchScalarGridSpec(
            num_scalar_prefetch=0,
            grid=(pl.cdiv(M, block_m), H // block_h),
            in_specs=in_specs,
            out_specs=out_specs,
            scratch_shapes=[
                pltpu.VMEM((block_m, D), jnp.bfloat16),   # a = linear_in(x)
                pltpu.VMEM((block_m, D), jnp.float32),    # g = linear_out(x)
                pltpu.VMEM((block_m, D), jnp.float32),    # s accumulator
            ],
        ),
        compiler_params=pltpu.CompilerParams(
            dimension_semantics=("parallel", "arbitrary"),
            vmem_limit_bytes=vmem_limit,
        ),
        cost_estimate=cost,
    )(x2, w_ig, b_ig, w_h1, b_h1, w_h2, b_h2)


def prepare_swiglu_params(params):
    """One-time weight prep (hoisted out of the per-call hot path).

    Fuses linear_in/linear_out into a single (D, 2D) projection, casts weights
    to bf16 for the MXU (biases stay f32), and zero-pads the hidden dim to a
    multiple of 128 so streamed hidden tiles never read out of bounds (zero
    columns/rows contribute exactly 0 to the accumulator).
    """
    D = params["w_in"].shape[0]
    H = params["w_h1"].shape[1]
    Hp = _round_up(H, _LANE)
    w_h1, b_h1, w_h2 = params["w_h1"], params["b_h1"], params["w_h2"]
    if Hp != H:
        w_h1 = jnp.pad(w_h1, ((0, 0), (0, Hp - H)))
        b_h1 = jnp.pad(b_h1, ((0, Hp - H),))
        w_h2 = jnp.pad(w_h2, ((0, Hp - H), (0, 0)))
    return {
        "D": D,
        "H": Hp,
        "w_ig": jnp.concatenate([params["w_in"], params["w_out"]],
                                axis=1).astype(jnp.bfloat16),
        "b_ig": jnp.concatenate([params["b_in"], params["b_out"]]
                                ).reshape(1, -1).astype(jnp.float32),
        "w_h1": w_h1.astype(jnp.bfloat16),
        "b_h1": b_h1.reshape(1, -1).astype(jnp.float32),
        "w_h2": w_h2.astype(jnp.bfloat16),
        "b_h2": params["b_h2"].reshape(1, -1).astype(jnp.float32),
    }


def swiglu_pallas(x, prepared, *, block_m=None, block_h=None):
    """Fused SwiGLU forward. x: (..., D); `prepared` from prepare_swiglu_params."""
    D, H = prepared["D"], prepared["H"]
    assert x.shape[-1] == D
    assert D % _LANE == 0, "dim must be a multiple of 128 (lane width)"

    orig_shape = x.shape
    x2 = x.reshape(-1, D)          # no cast / pad here: kernel casts, grid masks
    M = x2.shape[0]

    vmem_cap = _vmem_capacity_bytes()

    if block_m is None:
        # 512-row tiles where VMEM allows (v5e/v6e: 128 MiB), 256 on v7x (64 MiB);
        # multiple of 16 for bf16 sublane packing; shrink for tiny inputs.
        bm_target = 512 if vmem_cap >= (96 << 20) else 256
        bm = min(bm_target, _round_up(max(M, 1), _SUBLANE_BF16))
        if M > _SUBLANE_BF16 and pl.cdiv(M, bm) == 1:
            # Split the row axis so both v7x TensorCores get work.
            bm = max(_SUBLANE_BF16, _round_up((M + 1) // 2, _SUBLANE_BF16))
    else:
        bm = block_m

    if block_h is None:
        # Hidden tile: multiple of 256 for the v6e/v7x 256-wide MXU when H allows.
        if H % 512 == 0:
            bh = 512
        elif H % 256 == 0:
            bh = 256
        else:
            bh = _LANE           # H is padded to a multiple of 128 in prepare
    else:
        bh = block_h

    # Per-TensorCore VMEM budget: double-buffered blocks + scratch + headroom,
    # clamped below the physical capacity of this TPU generation.
    x_isz = x2.dtype.itemsize
    o_isz = x_isz
    weight_bytes = 2 * (D * 2 * D) * 2                     # w_ig, 2 bufs, bf16
    stream_bytes = 2 * (D * bh + bh * D) * 2               # w_h1+w_h2 tiles, bf16
    bias_bytes = 2 * 4 * (2 * D + bh + D)
    io_bytes = 2 * bm * D * (x_isz + o_isz)
    scratch_bytes = bm * D * (2 + 4 + 4)
    vmem_limit = (weight_bytes + stream_bytes + bias_bytes + io_bytes
                  + scratch_bytes + (8 << 20))
    vmem_limit = int(min(max(vmem_limit, 32 << 20), vmem_cap - (8 << 20)))

    out = _swiglu_call(
        x2, prepared["w_ig"], prepared["b_ig"],
        prepared["w_h1"], prepared["b_h1"],
        prepared["w_h2"], prepared["b_h2"],
        block_m=bm, block_h=bh, vmem_limit=vmem_limit, out_dtype=x2.dtype)
    return out.reshape(orig_shape)


def init_params(key, dim, hidden_dim, dtype=jnp.float32):
    """Deterministic synthetic params. Weights stored as (in, out)."""
    ks = jax.random.split(key, 8)
    scale = 0.05
    return {
        "w_in":  scale * jax.random.normal(ks[0], (dim, dim), dtype),
        "b_in":  scale * jax.random.normal(ks[1], (dim,), dtype),
        "w_h1":  scale * jax.random.normal(ks[2], (dim, hidden_dim), dtype),
        "b_h1":  scale * jax.random.normal(ks[3], (hidden_dim,), dtype),
        "w_h2":  scale * jax.random.normal(ks[4], (hidden_dim, dim), dtype),
        "b_h2":  scale * jax.random.normal(ks[5], (dim,), dtype),
        "w_out": scale * jax.random.normal(ks[6], (dim, dim), dtype),
        "b_out": scale * jax.random.normal(ks[7], (dim,), dtype),
    }


def swiglu_ref(x, p):
    """Pure-JAX f32 reference mirroring the PyTorch forward."""
    a = x @ p["w_in"] + p["b_in"]
    h = a @ p["w_h1"] + p["b_h1"]
    swish = h * jax.nn.sigmoid(h)
    s = swish @ p["w_h2"] + p["b_h2"]
    return s * (x @ p["w_out"] + p["b_out"])


if __name__ == "__main__":
    key = jax.random.PRNGKey(0)
    k_x, k_p = jax.random.split(key)

    # Small, lane-dense demo shape (D, H multiples of 128).
    B, S, D, H = 2, 8, 128, 256
    x = jax.random.normal(k_x, (B, S, D), jnp.float32)
    params = init_params(k_p, D, H)
    prepared = prepare_swiglu_params(params)   # one-time weight fusion / casts

    out = jax.block_until_ready(swiglu_pallas(x, prepared))
    ref = swiglu_ref(x, params)
    assert out.shape == x.shape
    # bf16 MXU inputs -> tolerance loosened vs. the pure-f32 reference.
    assert jnp.allclose(out, ref, atol=2e-2, rtol=5e-2), "mismatch vs reference"

    # Ragged row count (M = 15): exercises the cdiv grid / masked last tile path.
    x3 = jax.random.normal(k_x, (3, 5, D), jnp.float32)
    out3 = jax.block_until_ready(swiglu_pallas(x3, prepared))
    ref3 = swiglu_ref(x3, params)
    assert jnp.allclose(out3, ref3, atol=2e-2, rtol=5e-2), "mismatch (ragged)"

    print("KERNEL_OK")
</pallas_src>

<mosaic_0001>
module attributes {stable_mosaic.version = 11 : i64} {
  func.func @_swiglu_kernel(%arg0: i32, %arg1: i32, %arg2: memref<16x128xf32, #tpu.memory_space<vmem>>, %arg3: memref<128x256xbf16, #tpu.memory_space<vmem>>, %arg4: memref<1x256xf32, #tpu.memory_space<vmem>>, %arg5: memref<128x256xbf16, #tpu.memory_space<vmem>>, %arg6: memref<1x256xf32, #tpu.memory_space<vmem>>, %arg7: memref<256x128xbf16, #tpu.memory_space<vmem>>, %arg8: memref<1x128xf32, #tpu.memory_space<vmem>>, %arg9: memref<16x128xf32, #tpu.memory_space<vmem>>, %arg10: memref<16x128xbf16, #tpu.memory_space<vmem>>, %arg11: memref<16x128xf32, #tpu.memory_space<vmem>>, %arg12: memref<16x128xf32, #tpu.memory_space<vmem>>) attributes {dimension_semantics = [#tpu.dimension_semantics<parallel>, #tpu.dimension_semantics<arbitrary>], iteration_bounds = array<i64: 1, 1>, scalar_prefetch = 0 : i64, scratch_operands = 3 : i64, tpu.core_type = #tpu.core_type<tc>, window_params = [{transform_indices = @transform_0, window_bounds = array<i64: 16, 128>}, {pipeline_mode = #tpu.pipeline_mode<synchronous>, transform_indices = @transform_1, window_bounds = array<i64: 128, 256>}, {pipeline_mode = #tpu.pipeline_mode<synchronous>, transform_indices = @transform_2, window_bounds = array<i64: 1, 256>}, {transform_indices = @transform_3, window_bounds = array<i64: 128, 256>}, {transform_indices = @transform_4, window_bounds = array<i64: 1, 256>}, {transform_indices = @transform_5, window_bounds = array<i64: 256, 128>}, {pipeline_mode = #tpu.pipeline_mode<synchronous>, transform_indices = @transform_6, window_bounds = array<i64: 1, 128>}, {transform_indices = @transform_7, window_bounds = array<i64: 16, 128>}]} {
    %c0_i32 = arith.constant 0 : i32
    %0 = arith.cmpi eq, %arg1, %c0_i32 : i32
    %1 = arith.extui %0 : i1 to i32
    %c0_i32_0 = arith.constant 0 : i32
    %2 = arith.cmpi ne, %1, %c0_i32_0 : i32
    scf.if %2 {
      %c0_16 = arith.constant 0 : index
      %c0_17 = arith.constant 0 : index
      %24 = vector.load %arg2[%c0_16, %c0_17] : memref<16x128xf32, #tpu.memory_space<vmem>>, vector<16x128xf32>
      %25 = arith.truncf %24 : vector<16x128xf32> to vector<16x128xbf16>
      %c0_18 = arith.constant 0 : index
      %c0_19 = arith.constant 0 : index
      %26 = vector.load %arg3[%c0_18, %c0_19] : memref<128x256xbf16, #tpu.memory_space<vmem>>, vector<128x256xbf16>
      %cst_20 = arith.constant dense<0.000000e+00> : vector<16x256xf32>
      %27 = tpu.matmul %25, %26, %cst_20 {dimension_numbers = #tpu.dot_dimension_numbers<[1], [0], [0], [1], [0, 0, 1, 1], [], []>} : vector<16x128xbf16>, vector<128x256xbf16>, vector<16x256xf32> -> vector<16x256xf32>
      %c0_21 = arith.constant 0 : index
      %c0_22 = arith.constant 0 : index
      %28 = vector.load %arg4[%c0_21, %c0_22] : memref<1x256xf32, #tpu.memory_space<vmem>>, vector<1x256xf32>
      %29 = vector.broadcast %28 : vector<1x256xf32> to vector<16x256xf32>
      %30 = arith.addf %27, %29 : vector<16x256xf32>
      %31 = vector.extract_strided_slice %30 {offsets = [0, 0], sizes = [16, 128], strides = [1, 1]} : vector<16x256xf32> to vector<16x128xf32>
      %32 = arith.truncf %31 : vector<16x128xf32> to vector<16x128xbf16>
      %c0_23 = arith.constant 0 : index
      %c0_24 = arith.constant 0 : index
      %33 = vector.load %arg10[%c0_23, %c0_24] : memref<16x128xbf16, #tpu.memory_space<vmem>>, vector<16x128xbf16>
      tpu.vector_store %arg10[%c0_23, %c0_24], %32 {strides = array<i32>} : memref<16x128xbf16, #tpu.memory_space<vmem>>, vector<16x128xbf16>,
      %34 = vector.extract_strided_slice %30 {offsets = [0, 128], sizes = [16, 128], strides = [1, 1]} : vector<16x256xf32> to vector<16x128xf32>
      %c0_25 = arith.constant 0 : index
      %c0_26 = arith.constant 0 : index
      %35 = vector.load %arg11[%c0_25, %c0_26] : memref<16x128xf32, #tpu.memory_space<vmem>>, vector<16x128xf32>
      tpu.vector_store %arg11[%c0_25, %c0_26], %34 {strides = array<i32>} : memref<16x128xf32, #tpu.memory_space<vmem>>, vector<16x128xf32>,
      %cst_27 = arith.constant 0.000000e+00 : f32
      %36 = vector.broadcast %cst_27 : f32 to vector<16x128xf32>
      %c0_28 = arith.constant 0 : index
      %c0_29 = arith.constant 0 : index
      %37 = vector.load %arg12[%c0_28, %c0_29] : memref<16x128xf32, #tpu.memory_space<vmem>>, vector<16x128xf32>
      tpu.vector_store %arg12[%c0_28, %c0_29], %36 {strides = array<i32>} : memref<16x128xf32, #tpu.memory_space<vmem>>, vector<16x128xf32>,
    } else {
    }
    %c0 = arith.constant 0 : index
    %c0_1 = arith.constant 0 : index
    %3 = vector.load %arg10[%c0, %c0_1] : memref<16x128xbf16, #tpu.memory_space<vmem>>, vector<16x128xbf16>
    %c0_2 = arith.constant 0 : index
    %c0_3 = arith.constant 0 : index
    %4 = vector.load %arg5[%c0_2, %c0_3] : memref<128x256xbf16, #tpu.memory_space<vmem>>, vector<128x256xbf16>
    %cst = arith.constant dense<0.000000e+00> : vector<16x256xf32>
    %5 = tpu.matmul %3, %4, %cst {dimension_numbers = #tpu.dot_dimension_numbers<[1], [0], [0], [1], [0, 0, 1, 1], [], []>} : vector<16x128xbf16>, vector<128x256xbf16>, vector<16x256xf32> -> vector<16x256xf32>
    %c0_4 = arith.constant 0 : index
    %c0_5 = arith.constant 0 : index
    %6 = vector.load %arg6[%c0_4, %c0_5] : memref<1x256xf32, #tpu.memory_space<vmem>>, vector<1x256xf32>
    %7 = vector.broadcast %6 : vector<1x256xf32> to vector<16x256xf32>
    %8 = arith.addf %5, %7 : vector<16x256xf32>
    %9 = arith.negf %8 : vector<16x256xf32>
    %10 = math.exp %9 : vector<16x256xf32>
    %cst_6 = arith.constant 1.000000e+00 : f32
    %11 = vector.broadcast %cst_6 : f32 to vector<16x256xf32>
    %12 = arith.addf %11, %10 : vector<16x256xf32>
    %13 = arith.divf %11, %12 : vector<16x256xf32>
    %14 = arith.mulf %8, %13 : vector<16x256xf32>
    %c0_7 = arith.constant 0 : index
    %c0_8 = arith.constant 0 : index
    %15 = vector.load %arg12[%c0_7, %c0_8] : memref<16x128xf32, #tpu.memory_space<vmem>>, vector<16x128xf32>
    %16 = arith.truncf %14 : vector<16x256xf32> to vector<16x256xbf16>
    %c0_9 = arith.constant 0 : index
    %c0_10 = arith.constant 0 : index
    %17 = vector.load %arg7[%c0_9, %c0_10] : memref<256x128xbf16, #tpu.memory_space<vmem>>, vector<256x128xbf16>
    %cst_11 = arith.constant dense<0.000000e+00> : vector<16x128xf32>
    %18 = tpu.matmul %16, %17, %cst_11 {dimension_numbers = #tpu.dot_dimension_numbers<[1], [0], [0], [1], [0, 0, 1, 1], [], []>} : vector<16x256xbf16>, vector<256x128xbf16>, vector<16x128xf32> -> vector<16x128xf32>
    %19 = arith.addf %15, %18 : vector<16x128xf32>
    %c0_12 = arith.constant 0 : index
    %c0_13 = arith.constant 0 : index
    %20 = vector.load %arg12[%c0_12, %c0_13] : memref<16x128xf32, #tpu.memory_space<vmem>>, vector<16x128xf32>
    tpu.vector_store %arg12[%c0_12, %c0_13], %19 {strides = array<i32>} : memref<16x128xf32, #tpu.memory_space<vmem>>, vector<16x128xf32>,
    %c0_i32_14 = arith.constant 0 : i32
    %21 = arith.cmpi eq, %arg1, %c0_i32_14 : i32
    %22 = arith.extui %21 : i1 to i32
    %c0_i32_15 = arith.constant 0 : i32
    %23 = arith.cmpi ne, %22, %c0_i32_15 : i32
    scf.if %23 {
      %c0_16 = arith.constant 0 : index
      %c0_17 = arith.constant 0 : index
      %24 = vector.load %arg12[%c0_16, %c0_17] : memref<16x128xf32, #tpu.memory_space<vmem>>, vector<16x128xf32>
      %c0_18 = arith.constant 0 : index
      %c0_19 = arith.constant 0 : index
      %25 = vector.load %arg8[%c0_18, %c0_19] : memref<1x128xf32, #tpu.memory_space<vmem>>, vector<1x128xf32>
      %26 = vector.broadcast %25 : vector<1x128xf32> to vector<16x128xf32>
      %27 = arith.addf %24, %26 : vector<16x128xf32>
      %c0_20 = arith.constant 0 : index
      %c0_21 = arith.constant 0 : index
      %28 = vector.load %arg11[%c0_20, %c0_21] : memref<16x128xf32, #tpu.memory_space<vmem>>, vector<16x128xf32>
      %29 = arith.mulf %27, %28 : vector<16x128xf32>
      %c0_22 = arith.constant 0 : index
      %c0_23 = arith.constant 0 : index
      %30 = vector.load %arg9[%c0_22, %c0_23] : memref<16x128xf32, #tpu.memory_space<vmem>>, vector<16x128xf32>
      tpu.vector_store %arg9[%c0_22, %c0_23], %29 {strides = array<i32>} : memref<16x128xf32, #tpu.memory_space<vmem>>, vector<16x128xf32>,
    } else {
    }
    return
  }
  func.func @transform_0(%arg0: i32, %arg1: i32) -> (i32, i32) {
    %c0_i32 = arith.constant 0 : i32
    %c0_i32_0 = arith.constant 0 : i32
    return %arg0, %c0_i32 : i32, i32
  }
  func.func @transform_1(%arg0: i32, %arg1: i32) -> (i32, i32) {
    %c0_i32 = arith.constant 0 : i32
    %c0_i32_0 = arith.constant 0 : i32
    %c0_i32_1 = arith.constant 0 : i32
    return %c0_i32, %c0_i32_0 : i32, i32
  }
  func.func @transform_2(%arg0: i32, %arg1: i32) -> (i32, i32) {
    %c0_i32 = arith.constant 0 : i32
    %c0_i32_0 = arith.constant 0 : i32
    %c0_i32_1 = arith.constant 0 : i32
    return %c0_i32, %c0_i32_0 : i32, i32
  }
  func.func @transform_3(%arg0: i32, %arg1: i32) -> (i32, i32) {
    %c0_i32 = arith.constant 0 : i32
    %c0_i32_0 = arith.constant 0 : i32
    return %c0_i32, %arg1 : i32, i32
  }
  func.func @transform_4(%arg0: i32, %arg1: i32) -> (i32, i32) {
    %c0_i32 = arith.constant 0 : i32
    %c0_i32_0 = arith.constant 0 : i32
    return %c0_i32, %arg1 : i32, i32
  }
  func.func @transform_5(%arg0: i32, %arg1: i32) -> (i32, i32) {
    %c0_i32 = arith.constant 0 : i32
    %c0_i32_0 = arith.constant 0 : i32
    return %arg1, %c0_i32 : i32, i32
  }
  func.func @transform_6(%arg0: i32, %arg1: i32) -> (i32, i32) {
    %c0_i32 = arith.constant 0 : i32
    %c0_i32_0 = arith.constant 0 : i32
    %c0_i32_1 = arith.constant 0 : i32
    return %c0_i32, %c0_i32_0 : i32, i32
  }
  func.func @transform_7(%arg0: i32, %arg1: i32) -> (i32, i32) {
    %c0_i32 = arith.constant 0 : i32
    %c0_i32_0 = arith.constant 0 : i32
    return %arg0, %c0_i32 : i32, i32
  }
}

</mosaic_0001>

<bundles_post_ra>
// kernel: _swiglu_call.1
= control target key start
LH: loop header
LB: loop body
LE: loop exit
PB: predicated region body
PF: predicated region fallthrough
CT: control target
= control target key end

     0   :  { %12 = vsyncpa [#allocation6], 0  ;;  %s1085_s0 = inlined_call_operand.hbm [shape: f32[16,128], index: 0, kind: input, shape index: {}]   ;;  %s1086_s1 = inlined_call_operand.hbm [shape: bf16[128,256], index: 1, kind: input, shape index: {}]   ;;  %s1087_s2 = inlined_call_operand.vmem [shape: f32[1,256], index: 2, kind: input, shape index: {}]   ;;  %s1088_s3 = inlined_call_operand.hbm [shape: bf16[128,256], index: 3, kind: input, shape index: {}]   ;;  %s1089_s4 = inlined_call_operand.vmem [shape: f32[1,256], index: 4, kind: input, shape index: {}]   ;;  %s1090_s5 = inlined_call_operand.hbm [shape: bf16[256,128], index: 5, kind: input, shape index: {}]   ;;  %s1091_s6 = inlined_call_operand.vmem [shape: f32[1,128], index: 6, kind: input, shape index: {}]   ;;  %s1092_s7 = inlined_call_operand.hbm [shape: f32[16,128], index: 7, kind: output, shape index: {}]  }
   0x1   :  { %13 = vsyncpa [#allocation9], 0 }
   0x2   :  { %14 = vsyncpa [#allocation12], 0 }
   0x3   :  { %15 = vsyncpa [#allocation7], 0  ;;  %s926_s24 = smov [#allocation8]   ;;  %s927_s26 = smov [#allocation5]  }
   0x4   :  { %s33_s25 = sshll.u32 %s926_s24, 4  ;;  %s21_s27 = sshll.u32 %s927_s26, 4  ;;  %s34_s25 = int_to_ptr.vmem [resolvable:$true] %s33_s25  ;;  %s976_s27 = int_to_ptr.vmem [resolvable:$true] %s21_s27 }
   0x5   :  { %s808_s30 = scalar_lea.hbm %s1086_s1, 2048 }
   0x6   :  { %p809_p0 = scmp.ne.s32.totalorder %s1086_s1, %s808_s30  ;;  %p812_p1 = scmp.lt.u32.totalorder %s808_s30, %s1086_s1 }
   0x8   :  { %p814_p2 = pnand %p812_p1, %p809_p0 }
   0xa   :  { %817 = shalt.err (!%p814_p2)
}
   0xb   :  { %s818_s12 = scalar_lea.vmem %s34_s25, 2048  ;;  %p823_p4 = scmp.lt.s32.totalorder %s34_s25, %s34_s25 }
   0xc   :  { %p819_p3 = scmp.ne.s32.totalorder %s34_s25, %s818_s12  ;;  %p824_p5 = scmp.lt.s32.totalorder %s818_s12, %s818_s12 }
   0xe   :  { %p825_p6 = por %p824_p5, %p823_p4 }
  0x10   :  { %p826_p7 = pnand %p825_p6, %p819_p3 }
  0x12   :  { %829 = shalt.err (!%p826_p7)
}
  0x13   :  { %s928_s13 = smov 128   ;;  %s929_s14 = smov 8  }
  0x14   :  { %39 = dma.hbm_to_vmem [thread:$0]  %s1086_s1, 2048, %s34_s25, [#allocation9], %s928_s13, %s928_s13, %s929_s14  }
  0x15   :  { %s830_s19 = scalar_lea.hbm %s1085_s0, 256 }
  0x16   :  { %p831_p8 = scmp.ne.s32.totalorder %s1085_s0, %s830_s19  ;;  %p834_p9 = scmp.lt.u32.totalorder %s830_s19, %s1085_s0 }
  0x18   :  { %p836_p10 = pnand %p834_p9, %p831_p8 }
  0x1a   :  { %839 = shalt.err (!%p836_p10)
}
  0x1b   :  { %s840_s24 = scalar_lea.vmem %s976_s27, 256  ;;  %p845_p12 = scmp.lt.s32.totalorder %s976_s27, %s976_s27 }
  0x1c   :  { %p841_p11 = scmp.ne.s32.totalorder %s976_s27, %s840_s24  ;;  %p846_p13 = scmp.lt.s32.totalorder %s840_s24, %s840_s24 }
  0x1e   :  { %p847_p0 = por %p846_p13, %p845_p12 }
  0x20   :  { %p848_p1 = pnand %p847_p0, %p841_p11 }
  0x22   :  { %851 = shalt.err (!%p848_p1)
}
  0x23   :  { %27 = dma.hbm_to_vmem [thread:$0]  %s1085_s0, 256, %s976_s27, [#allocation6], %s928_s13, %s928_s13, %s929_s14  }
  0x24   :  { %s930_s26 = smov [#allocation10]   ;;  %s931_s29 = smov [#allocation11]  }
  0x25   :  { %s47_s28 = sshll.u32 %s930_s26, 4  ;;  %s61_s30 = sshll.u32 %s931_s29, 4  ;;  %s48_s28 = int_to_ptr.vmem [resolvable:$true] %s47_s28  ;;  %s1013_s30 = int_to_ptr.vmem [resolvable:$true] %s61_s30 }
  0x26   :  { %s852_s10 = scalar_lea.hbm %s1088_s3, 2048 }
  0x27   :  { %p853_p2 = scmp.ne.s32.totalorder %s1088_s3, %s852_s10  ;;  %p856_p3 = scmp.lt.u32.totalorder %s852_s10, %s1088_s3 }
  0x29   :  { %p858_p4 = pnand %p856_p3, %p853_p2 }
  0x2b   :  { %861 = shalt.err (!%p858_p4)
}
  0x2c   :  { %s862_s0 = scalar_lea.vmem %s48_s28, 2048  ;;  %p867_p6 = scmp.lt.s32.totalorder %s48_s28, %s48_s28 }
  0x2d   :  { %p863_p5 = scmp.ne.s32.totalorder %s48_s28, %s862_s0  ;;  %p868_p7 = scmp.lt.s32.totalorder %s862_s0, %s862_s0 }
  0x2f   :  { %p869_p8 = por %p868_p7, %p867_p6 }
  0x31   :  { %p870_p9 = pnand %p869_p8, %p863_p5 }
  0x33   :  { %873 = shalt.err (!%p870_p9)
}
  0x34   :  { %53 = dma.hbm_to_vmem [thread:$0]  %s1088_s3, 2048, %s48_s28, [#allocation9], %s928_s13, %s928_s13, %s929_s14  }
  0x35   :  { %s874_s20 = scalar_lea.hbm %s1090_s5, 2048 }
  0x36   :  { %p875_p10 = scmp.ne.s32.totalorder %s1090_s5, %s874_s20  ;;  %p878_p11 = scmp.lt.u32.totalorder %s874_s20, %s1090_s5 }
  0x38   :  { %p880_p12 = pnand %p878_p11, %p875_p10 }
  0x3a   :  { %883 = shalt.err (!%p880_p12)
}
  0x3b   :  { %s884_s1 = scalar_lea.vmem %s1013_s30, 2048  ;;  %p889_p0 = scmp.lt.s32.totalorder %s1013_s30, %s1013_s30 }
  0x3c   :  { %p885_p13 = scmp.ne.s32.totalorder %s1013_s30, %s884_s1  ;;  %p890_p1 = scmp.lt.s32.totalorder %s884_s1, %s884_s1 }
  0x3e   :  { %p891_p2 = por %p890_p1, %p889_p0 }
  0x40   :  { %p892_p3 = pnand %p891_p2, %p885_p13 }
  0x42   :  { %895 = shalt.err (!%p892_p3)
}
  0x43   :  { %s932_s3 = smov 64   ;;  %s933_s25 = smov 4  }
  0x44   :  { %67 = dma.hbm_to_vmem [thread:$0]  %s1090_s5, 2048, %s1013_s30, [#allocation12], %s932_s3, %s932_s3, %s933_s25  }
  0x45   :  { %918 = dma.done.wait [#allocation6], 256  }
  0x46   :  { %919 = vsyncadd [#allocation6], 4294967040 }
  0x47   :  { %920 = dma.done.wait [#allocation9], 4096  }
  0x48   :  { %921 = vsyncadd [#allocation9], 4294963200 }
  0x49   :  { %922 = dma.done.wait [#allocation12], 2048  }
  0x4a   :  { %923 = vsyncadd [#allocation12], 4294965248  ;;  %v934_v0 = vmov 0   ;;  %v728_v1 = vld [vmem:[#allocation8 + $0x4] ss:$8 sps:$4 sm:$0xff]   ;;  %v87_v26 = vld [vmem:[#allocation5] sm:$0xff]  ;;  %v108_v36 = vlaneseq }
  0x4b   :  { %230 = vmatprep.mubr.bf16.mxu0 %v934_v0  ;;  %388 = vmatprep.mubr.bf16.mxu1 %v934_v0  ;;  %v730_v2 = vld [vmem:[#allocation8] ss:$8 sps:$4 sm:$0xff]   ;;  %v731_v3 = vld [vmem:[#allocation8 + $0x14] ss:$8 sps:$4 sm:$0xff]   ;;  %v733_v4 = vld [vmem:[#allocation8 + $0x10] ss:$8 sps:$4 sm:$0xff]  }
  0x4c   :  { %198 = vmatprep.subr.bf16.mxu0 %v728_v1  ;;  %v734_v5 = vld [vmem:[#allocation8 + $0x24] ss:$8 sps:$4 sm:$0xff]   ;;  %v736_v6 = vld [vmem:[#allocation8 + $0x20] ss:$8 sps:$4 sm:$0xff]   ;;  %v737_v7 = vld [vmem:[#allocation8 + $0x34] ss:$8 sps:$4 sm:$0xff]  }
  0x4d   :  { %199 = vmatpush1.bf16.msra.mxu0 %v730_v2  ;;  %v739_v8 = vld [vmem:[#allocation8 + $0x30] ss:$8 sps:$4 sm:$0xff]   ;;  %v740_v9 = vld [vmem:[#allocation8 + $0x44] ss:$8 sps:$4 sm:$0xff]   ;;  %v754_v11 = vld [vmem:[#allocation10] ss:$8 sps:$4 sm:$0xff]  }
  0x4e   :  { %200 = vmatprep.subr.bf16.mxu0 %v731_v3  ;;  %v752_v10 = vld [vmem:[#allocation10 + $0x4] ss:$8 sps:$4 sm:$0xff]   ;;  %v755_v12 = vld [vmem:[#allocation10 + $0x14] ss:$8 sps:$4 sm:$0xff]   ;;  %v742_v13 = vld [vmem:[#allocation8 + $0x40] ss:$8 sps:$4 sm:$0xff]  }
  0x4f   :  { %356 = vmatprep.subr.bf16.mxu1 %v752_v10  ;;  %v757_v14 = vld [vmem:[#allocation10 + $0x10] ss:$8 sps:$4 sm:$0xff]   ;;  %v743_v15 = vld [vmem:[#allocation8 + $0x54] ss:$8 sps:$4 sm:$0xff]   ;;  %v758_v16 = vld [vmem:[#allocation10 + $0x24] ss:$8 sps:$4 sm:$0xff]  }
  0x50   :  { %357 = vmatpush1.bf16.msra.mxu1 %v754_v11  ;;  %v745_v17 = vld [vmem:[#allocation8 + $0x50] ss:$8 sps:$4 sm:$0xff]   ;;  %v760_v18 = vld [vmem:[#allocation10 + $0x20] ss:$8 sps:$4 sm:$0xff]   ;;  %v746_v19 = vld [vmem:[#allocation8 + $0x64] ss:$8 sps:$4 sm:$0xff]  }
  0x51   :  { %201 = vmatpush1.bf16.msra.mxu0 %v733_v4  ;;  %358 = vmatprep.subr.bf16.mxu1 %v755_v12  ;;  %v761_v20 = vld [vmem:[#allocation10 + $0x34] ss:$8 sps:$4 sm:$0xff]   ;;  %v748_v21 = vld [vmem:[#allocation8 + $0x60] ss:$8 sps:$4 sm:$0xff]   ;;  %v763_v22 = vld [vmem:[#allocation10 + $0x30] ss:$8 sps:$4 sm:$0xff]  }
  0x52   :  { %202 = vmatprep.subr.bf16.mxu0 %v734_v5  ;;  %v749_v23 = vld [vmem:[#allocation8 + $0x74] ss:$8 sps:$4 sm:$0xff]   ;;  %v764_v24 = vld [vmem:[#allocation10 + $0x44] ss:$8 sps:$4 sm:$0xff]   ;;  %v751_v25 = vld [vmem:[#allocation8 + $0x70] ss:$8 sps:$4 sm:$0xff]  }
  0x53   :  { %v88_v27 = vld [vmem:[#allocation5 + $0x8] sm:$0xff]  ;;  %v766_v28 = vld [vmem:[#allocation10 + $0x40] ss:$8 sps:$4 sm:$0xff]   ;;  %v770_v32 = vld [vmem:[#allocation10 + $0x64] ss:$8 sps:$4 sm:$0xff]   ;;  %v1047_v37 = vshrl.u32 %v108_v36, 7 }
  0x54   :  { %359 = vmatpush1.bf16.msra.mxu1 %v757_v14  ;;  %v767_v29 = vld [vmem:[#allocation10 + $0x54] ss:$8 sps:$4 sm:$0xff]   ;;  %v769_v30 = vld [vmem:[#allocation10 + $0x50] ss:$8 sps:$4 sm:$0xff]   ;;  %v89_v31 = vpack.c.bf16 %v88_v27, %v87_v26  ;;  %v772_v33 = vld [vmem:[#allocation10 + $0x60] ss:$8 sps:$4 sm:$0xff]  }
  0x55   :  { %203 = vmatpush1.bf16.msra.mxu0 %v736_v6  ;;  %360 = vmatprep.subr.bf16.mxu1 %v758_v16  ;;  %v773_v34 = vld [vmem:[#allocation10 + $0x74] ss:$8 sps:$4 sm:$0xff]   ;;  %v775_v35 = vld [vmem:[#allocation10 + $0x70] ss:$8 sps:$4 sm:$0xff]   ;;  %v110_v38 = vsub.s32 0, %v1047_v37  ;;  %v776_v48 = vld [vmem:[#allocation11 + $0x40] sm:$0xff]  }
  0x56   :  { %204 = vmatprep.subr.bf16.mxu0 %v737_v7  ;;  %v1053_v39 = vld [vmem:[%s1087_s2] sm:$0x3]  ;;  %v777_v49 = vld [vmem:[#allocation11] sm:$0xff]   ;;  %v778_v50 = vld [vmem:[#allocation11 + $0x48] sm:$0xff]   ;;  %v114_v1 = vsub.s32 1, %v1047_v37  ;;  %s935_s9 = smov [#allocation13]  }
  0x57   :  { %v111_v40 = vrot.slane %v1053_v39, %v110_v38  ;;  %v779_v51 = vld [vmem:[#allocation11 + $0x8] sm:$0xff]   ;;  %v780_v52 = vld [vmem:[#allocation11 + $0x50] sm:$0xff]   ;;  %v782_v54 = vld [vmem:[#allocation11 + $0x58] sm:$0xff]   ;;  %s629_s10 = sshll.u32 %s935_s9, 4  ;;  %s630_s10 = int_to_ptr.vmem [resolvable:$true] %s629_s10 }
  0x58   :  { %361 = vmatpush1.bf16.msra.mxu1 %v760_v18  ;;  %v781_v53 = vld [vmem:[#allocation11 + $0x10] sm:$0xff]   ;;  %v783_v55 = vld [vmem:[#allocation11 + $0x18] sm:$0xff]   ;;  %v784_v56 = vld [vmem:[#allocation11 + $0x60] sm:$0xff]   ;;  %s896_s11 = scalar_lea.vmem %s630_s10, 256  ;;  %p901_p5 = scmp.lt.s32.totalorder %s630_s10, %s630_s10 }
  0x59   :  { %205 = vmatpush1.bf16.msra.mxu0 %v739_v8  ;;  %362 = vmatprep.subr.bf16.mxu1 %v761_v20  ;;  %v785_v57 = vld [vmem:[#allocation11 + $0x20] sm:$0xff]   ;;  %v786_v58 = vld [vmem:[#allocation11 + $0x68] sm:$0xff]   ;;  %v788_v60 = vld [vmem:[#allocation11 + $0x70] sm:$0xff]   ;;  %p897_p4 = scmp.ne.s32.totalorder %s630_s10, %s896_s11  ;;  %p902_p6 = scmp.lt.s32.totalorder %s896_s11, %s896_s11 }
  0x5a   :  { %206 = vmatprep.subr.bf16.mxu0 %v740_v9  ;;  %v787_v59 = vld [vmem:[#allocation11 + $0x28] sm:$0xff]   ;;  %v789_v61 = vld [vmem:[#allocation11 + $0x30] sm:$0xff]   ;;  %v790_v62 = vld [vmem:[#allocation11 + $0x78] sm:$0xff]  }
  0x5b   :  { %v791_v63 = vld [vmem:[#allocation11 + $0x38] sm:$0xff]   ;;  %v264_v0 = vld [vmem:[%s1089_s4] sm:$0x3]  ;;  %p903_p7 = por %p902_p6, %p901_p5 }
  0x5c   :  { %363 = vmatpush1.bf16.msra.mxu1 %v763_v22  ;;  %v269_v2 = vrot.slane %v264_v0, %v110_v38  ;;  %v273_v3 = vrot.slane %v264_v0, %v114_v1  ;;  %v695_v37 = vld [vmem:[%s1091_s6] ss:$0 sm:$0xff] }
  0x5d   :  { %207 = vmatpush1.bf16.msra.mxu0 %v742_v13  ;;  %364 = vmatprep.subr.bf16.mxu1 %v764_v24  ;;  %p904_p8 = pnand %p903_p7, %p897_p4 }
  0x5e   :  { %208 = vmatprep.subr.bf16.mxu0 %v743_v15 }
  0x60   :  { %365 = vmatpush1.bf16.msra.mxu1 %v766_v28 }
  0x61   :  { %209 = vmatpush1.bf16.msra.mxu0 %v745_v17  ;;  %366 = vmatprep.subr.bf16.mxu1 %v767_v29 }
  0x62   :  { %210 = vmatprep.subr.bf16.mxu0 %v746_v19 }
  0x64   :  { %367 = vmatpush1.bf16.msra.mxu1 %v769_v30 }
  0x65   :  { %211 = vmatpush1.bf16.msra.mxu0 %v748_v21  ;;  %368 = vmatprep.subr.bf16.mxu1 %v770_v32 }
  0x66   :  { %212 = vmatprep.subr.bf16.mxu0 %v749_v23 }
  0x68   :  { %369 = vmatpush1.bf16.msra.mxu1 %v772_v33 }
  0x69   :  { %213 = vmatpush1.bf16.msra.mxu0 %v751_v25  ;;  %370 = vmatprep.subr.bf16.mxu1 %v773_v34  ;;  %v115_v34 = vrot.slane %v1053_v39, %v114_v1 }
  0x6a   :  { %696 = vmatprep.subr.bf16.mxu0 %v776_v48 }
  0x6c   :  { %231 = vmatmul.mubr.bf16.vlgmr.msra.gmra.mrb[0].mxu0 %v89_v31  ;;  %371 = vmatpush1.bf16.msra.mxu1 %v775_v35 }
  0x6d   :  { %697 = vmatpush3.bf16.msra.mxu0 %v777_v49 }
  0x6e   :  { %698 = vmatprep.subr.bf16.mxu0 %v778_v50 }
  0x71   :  { %699 = vmatpush3.bf16.msra.mxu0 %v779_v51 }
  0x72   :  { %700 = vmatprep.subr.bf16.mxu0 %v780_v52 }
  0x75   :  { %701 = vmatpush3.bf16.msra.mxu0 %v781_v53 }
  0x76   :  { %702 = vmatprep.subr.bf16.mxu0 %v782_v54 }
  0x79   :  { %703 = vmatpush3.bf16.msra.mxu0 %v783_v55 }
  0x7a   :  { %704 = vmatprep.subr.bf16.mxu0 %v784_v56 }
  0x7d   :  { %705 = vmatpush3.bf16.msra.mxu0 %v785_v57 }
  0x7e   :  { %706 = vmatprep.subr.bf16.mxu0 %v786_v58 }
  0x81   :  { %707 = vmatpush3.bf16.msra.mxu0 %v787_v59 }
  0x82   :  { %708 = vmatprep.subr.bf16.mxu0 %v788_v60 }
  0x85   :  { %709 = vmatpush3.bf16.msra.mxu0 %v789_v61 }
  0x86   :  { %710 = vmatprep.subr.bf16.mxu0 %v790_v62 }
  0x89   :  { %711 = vmatpush3.bf16.msra.mxu0 %v791_v63 }
 0x13f   :  { %v232_v41 = vpop.f32.mrb[0].mxu0 }
 0x140   :  { %v1056_v42 = vpop.f32.mrb[1].mxu0  ;;  %v233_v44 = vadd.f32 %v232_v41, %v111_v40 }
 0x141   :  { %v236_v43 = vpop.f32.mrb[2].mxu0 }
 0x142   :  { %v237_v45 = vadd.f32 %v236_v43, %v111_v40  ;;  %v1058_v46 = vpop.f32.mrb[3].mxu0  ;;  %v235_v43 = vadd.f32 %v1056_v42, %v115_v34 }
 0x144   :  { %v241_v47 = vpack.c.bf16 %v237_v45, %v233_v44 }
 0x146   :  { %389 = vmatmul.mubr.bf16.vlgmr.msra.gmra.mrb[0].mxu1 %v241_v47  ;;  %v239_v47 = vadd.f32 %v1058_v46, %v115_v34 }
 0x219   :  { %v390_v4 = vpop.f32.mrb[0].mxu1 }
 0x21a   :  { %v391_v5 = vadd.f32 %v390_v4, %v269_v2  ;;  %v392_v6 = vpop.f32.mrb[1].mxu1 }
 0x21b   :  { %v393_v7 = vadd.f32 %v392_v6, %v273_v3  ;;  %v394_v8 = vpop.f32.mrb[2].mxu1 }
 0x21c   :  { %v675_v9 = vmul.f32 -1.442695, %v391_v5  ;;  %v395_v10 = vadd.f32 %v394_v8, %v269_v2  ;;  %v396_v11 = vpop.f32.mrb[3].mxu1 }
 0x21d   :  { %v676_v12 = vmul.f32 -1.442695, %v393_v7  ;;  %v397_v13 = vadd.f32 %v396_v11, %v273_v3 }
 0x21e   :  { %792 = vpow2.f32 %v675_v9  ;;  %v677_v14 = vmul.f32 -1.442695, %v395_v10 }
 0x21f   :  { %794 = vpow2.f32 %v676_v12  ;;  %v678_v15 = vmul.f32 -1.442695, %v397_v13 }
 0x220   :  { %796 = vpow2.f32 %v677_v14 }
 0x221   :  { %798 = vpow2.f32 %v678_v15 }
 0x228   :  { %v793_v16 = vpop.eup %792 }
 0x229   :  { %v795_v17 = vpop.eup %794  ;;  %v411_v18 = vadd.f32 1.0, %v793_v16 }
 0x22a   :  { %v797_v19 = vpop.eup %796  ;;  %v412_v20 = vadd.f32 1.0, %v795_v17 }
 0x22b   :  { %v799_v21 = vpop.eup %798  ;;  %800 = vrcp.f32 %v411_v18  ;;  %v413_v22 = vadd.f32 1.0, %v797_v19 }
 0x22c   :  { %802 = vrcp.f32 %v412_v20  ;;  %v414_v23 = vadd.f32 1.0, %v799_v21 }
 0x22d   :  { %804 = vrcp.f32 %v413_v22 }
 0x22e   :  { %806 = vrcp.f32 %v414_v23 }
 0x235   :  { %v801_v24 = vpop.eup %800 }
 0x236   :  { %v803_v25 = vpop.eup %802  ;;  %v423_v28 = vmul.f32 %v801_v24, %v391_v5 }
 0x237   :  { %v805_v26 = vpop.eup %804  ;;  %v424_v30 = vmul.f32 %v803_v25, %v393_v7 }
 0x238   :  { %v807_v27 = vpop.eup %806  ;;  %v425_v29 = vmul.f32 %v805_v26, %v395_v10 }
 0x239   :  { %v426_v31 = vmul.f32 %v807_v27, %v397_v13 }
 0x23a   :  { %v429_v32 = vpack.c.bf16 %v425_v29, %v423_v28 }
 0x23b   :  { %v430_v33 = vpack.c.bf16 %v426_v31, %v424_v30 }
 0x23d   :  { %591 = vmatprep.mubr.bf16.mxu0 %v430_v33 }
 0x23e   :  { %592 = vmatmul.mubr.bf16.vlgmr.msra.gmra.mrb[4].mxu0 %v429_v32 }
 0x311   :  { %v712_v35 = vpop.f32.mrb[4].mxu0 }
 0x312   :  { %v713_v36 = vpop.f32.mrb[5].mxu0 }
 0x313   :  { %v714_v38 = vadd.f32 %v713_v36, %v712_v35  ;;  %v715_v40 = vpop.f32.mrb[6].mxu0 }
 0x314   :  { %v716_v41 = vpop.f32.mrb[7].mxu0 }
 0x315   :  { %v616_v44 = vadd.f32 %v714_v38, %v695_v37  ;;  %v717_v45 = vadd.f32 %v716_v41, %v715_v40 }
 0x317   :  { %v620_v48 = vmul.f32 %v616_v44, %v235_v43  ;;  %v617_v49 = vadd.f32 %v717_v45, %v695_v37 }
 0x319   :  { %622 = vst [vmem:[#allocation13] sm:$0xff] %v620_v48  ;;  %v621_v39 = vmul.f32 %v617_v49, %v239_v47 }
 0x31b   :  { %623 = vst [vmem:[#allocation13 + $0x8] sm:$0xff] %v621_v39 }
 0x31c   :  { %907 = shalt.err (!%p904_p8)
}
 0x31d   :  { %s908_s15 = scalar_lea.hbm %s1092_s7, 256 }
 0x31e   :  { %p909_p9 = scmp.ne.s32.totalorder %s1092_s7, %s908_s15  ;;  %p912_p10 = scmp.lt.u32.totalorder %s908_s15, %s1092_s7 }
 0x320   :  { %p914_p11 = pnand %p912_p10, %p909_p9 }
 0x322   :  { %917 = shalt.err (!%p914_p11)
}
 0x323   :  { %635 = dma.vmem_to_hbm [thread:$0]  %s630_s10, 256, %s1092_s7, [#allocation7], %s928_s13, %s928_s13, %s929_s14  }
 0x324   :  { %924 = dma.done.wait [#allocation7], 256  }
 0x325   :  { %925 = vsyncadd [#allocation7], 4294967040 }
 0x326   :  { %639 = vsyncpa [#allocation6], 1 }
 0x327   :  { %640 = vsyncpa [#allocation9], 1 }
 0x328   :  { %641 = vsyncpa [#allocation12], 1 }
 0x329   :  { %642 = vsyncpa [#allocation7], 1 }

</bundles_post_ra>
